<compile_context>
chip_gen: v7x
topology: tpu7x:2x2x1
jax: 0.10.0
libtpu: 0.0.40
codegen_flags: <defaults>
</compile_context>

<pallas_src>
import functools

import jax
import jax.numpy as jnp
import numpy as np
from jax.experimental import pallas as pl
from jax.experimental.pallas import tpu as pltpu


# ----------------------------------------------------------------------------
# Kernel: fused LIF rollout on a (tr, lane) row tile, T steps on the inner
# grid axis.  mem_ref (final-membrane output block, same block index for every
# t) stays VMEM-resident and acts as the recurrence carry.
# ----------------------------------------------------------------------------
def _lif_seq_kernel(x_ref, mem0_ref, spk_ref, mem_ref, *, beta, factor):
    t = pl.program_id(1)

    @pl.when(t == 0)
    def _():
        mem_ref[...] = mem0_ref[...]          # load initial membrane once

    new_mem = beta * mem_ref[...] + factor * x_ref[0]      # VPU elementwise
    spk = (new_mem > 1.0).astype(spk_ref.dtype)            # Heaviside forward
    spk_ref[0] = spk
    mem_ref[...] = new_mem - spk                            # soft reset carry


# ----------------------------------------------------------------------------
# Layout helpers.
# ----------------------------------------------------------------------------
def _sublane_rows(dtype):
    """Sublane granularity: 8 for 32-bit, 16 for bf16, 32 for int8/fp8."""
    return max(8, 32 // jnp.dtype(dtype).itemsize)


def _choose_view(total, sublane):
    """Fold `total` flat elements into a dense (rows, lane) view.

    padded = round_up(total, sublane*128) keeps rows a multiple of the sublane
    granularity and lane a multiple of 128 (unmasked vst).  Lane widening stops
    before rows would drop below the sublane granularity.
    """
    unit = sublane * 128
    padded = pl.cdiv(total, unit) * unit
    lane, rows = 128, padded // 128
    while lane < 1024 and rows % (2 * sublane) == 0:
        lane *= 2
        rows //= 2
    return rows, lane, padded


def _choose_row_tile(rows, lane, itemsize, sublane):
    """Row tile: sublane multiple, bounded by a ~1.5 MiB per-block budget
    (~8 blocks resident incl. double-buffering => ~12 MiB), and small enough
    that the parallel row axis gets >= 2 tiles when rows allow (v7x 2 TCs)."""
    budget_bytes = 3 * 512 * 1024                       # 1.5 MiB per block
    tr = (budget_bytes // (lane * itemsize)) // sublane * sublane
    tr = max(sublane, tr)
    if rows >= 2 * sublane:                             # keep >= 2 row tiles
        half = pl.cdiv(pl.cdiv(rows, 2), sublane) * sublane
        tr = min(tr, half)
    return min(tr, rows)


# ----------------------------------------------------------------------------
# Wrappers.
# ----------------------------------------------------------------------------
def _lif_sequence_pallas(x_seq, mem0, *, beta, factor):
    """Fused rollout.  x_seq: (T, ...state shape...), mem0: state shape.
    Returns (spikes (T, ...), final membrane (...))."""
    assert x_seq.ndim >= 2 and x_seq.shape[1:] == mem0.shape
    T = x_seq.shape[0]
    state_shape = mem0.shape
    total = int(np.prod(state_shape))
    dtype = x_seq.dtype
    itemsize = jnp.dtype(dtype).itemsize
    sublane = _sublane_rows(dtype)

    rows, lane, padded = _choose_view(total, sublane)
    xf = x_seq.reshape(T, total)
    mf = mem0.reshape(total)
    if padded != total:                      # lane-align by pad; sliced back below
        xf = jnp.pad(xf, ((0, 0), (0, padded - total)))
        mf = jnp.pad(mf, (0, padded - total))
    xv = xf.reshape(T, rows, lane)
    mv = mf.reshape(rows, lane)

    tr = _choose_row_tile(rows, lane, itemsize, sublane)
    grid = (pl.cdiv(rows, tr), T)

    x_spec = pl.BlockSpec((1, tr, lane), lambda i, t: (t, i, 0))   # streamed per t
    m_spec = pl.BlockSpec((tr, lane), lambda i, t: (i, 0))         # resident over t

    cost = pl.CostEstimate(
        flops=5 * T * padded,
        transcendentals=0,
        bytes_accessed=itemsize * (2 * T * padded + 2 * padded),
    )

    kernel = functools.partial(_lif_seq_kernel, beta=beta, factor=factor)
    spk, mem_out = pl.pallas_call(
        kernel,
        out_shape=(jax.ShapeDtypeStruct((T, rows, lane), dtype),
                   jax.ShapeDtypeStruct((rows, lane), dtype)),
        grid_spec=pltpu.PrefetchScalarGridSpec(
            num_scalar_prefetch=0,
            grid=grid,
            in_specs=[x_spec, m_spec],
            out_specs=[x_spec, m_spec],
        ),
        compiler_params=pltpu.CompilerParams(
            dimension_semantics=("parallel", "arbitrary"),
            vmem_limit_bytes=32 * 1024 * 1024),
        cost_estimate=cost,
    )(xv, mv)

    if padded != total:
        spk = spk.reshape(T, padded)[:, :total]
        mem_out = mem_out.reshape(padded)[:total]
    return spk.reshape((T,) + state_shape), mem_out.reshape(state_shape)


def _lif_step_pallas(x, mem, *, beta, factor):
    """Single timestep (same kernel, T = 1)."""
    spk_seq, mem_out = _lif_sequence_pallas(x[None], mem, beta=beta, factor=factor)
    return spk_seq[0], mem_out


# ----------------------------------------------------------------------------
# Module port.
# ----------------------------------------------------------------------------
class LIFNeuron:
    """JAX/Pallas port of the PyTorch LIFNeuron (forward pass only)."""

    def __init__(self, size, params):
        self.in_size = size
        self.out_size = size
        self.beta = float(np.exp(-1.0 / params['TAU']))
        if params['1-beta'] == 'improved':
            self.factor = float((1.0 - self.beta ** 2) ** 0.5)
        elif params['1-beta']:
            self.factor = 1.0 - self.beta
        else:
            self.factor = 1.0
        # BellecSpike / SuperSpike share the same Heaviside forward.
        # TODO(synk): surrogate gradients (their custom backward) would need a
        # jax.custom_vjp around the pallas_call; forward-only here.
        self.spike_fn_name = params.get('SPIKE_FN', 'superspike')
        # nn.Parameter(torch.zeros([size])) -> trainable initial membrane.
        self.initial_mem = jnp.zeros((size,), jnp.float32)
        self.target_var = 1
        self.est_rate = 0.06

    def get_initial_state(self, batch_size):
        return {'mem': jnp.broadcast_to(self.initial_mem,
                                        (batch_size, self.in_size))}

    def get_initial_output(self, batch_size):
        m = jnp.broadcast_to(self.initial_mem, (batch_size, self.in_size))
        return (m > 1.0).astype(jnp.float32)

    def __call__(self, x, h):
        """Single timestep, matching the PyTorch forward(x, h)."""
        spk, new_mem = _lif_step_pallas(
            x, h['mem'], beta=self.beta, factor=self.factor)
        return spk, {'mem': new_mem}

    def unroll(self, x_seq, h):
        """Fused rollout over the leading time axis (preferred on TPU)."""
        spk_seq, mem = _lif_sequence_pallas(
            x_seq, h['mem'], beta=self.beta, factor=self.factor)
        return spk_seq, {'mem': mem}


# Pure-JAX reference (mirrors the PyTorch math).
def _lif_ref_step(x, mem, beta, factor):
    new_mem = beta * mem + factor * x
    spk = (new_mem > 1.0).astype(new_mem.dtype)
    return spk, new_mem - spk


def _lif_ref_rollout(x_seq, mem0, beta, factor):
    mem = mem0
    spks = []
    for t in range(x_seq.shape[0]):
        spk, mem = _lif_ref_step(x_seq[t], mem, beta, factor)
        spks.append(spk)
    return jnp.stack(spks), mem


if __name__ == "__main__":
    key = jax.random.PRNGKey(0)
    k1, k2, k3 = jax.random.split(key, 3)

    # --- Test 1: fused rollout (B=2, N=32, T=8) ------------------------------
    B, N, T = 2, 32, 8
    params = {'TAU': 10.0, '1-beta': True, 'SPIKE_FN': 'superspike'}
    neuron = LIFNeuron(N, params)
    h = neuron.get_initial_state(B)
    x_seq = 2.0 * jax.random.normal(k1, (T, B, N), jnp.float32)
    spk_seq, h_out = neuron.unroll(x_seq, h)
    spk_seq = jax.block_until_ready(spk_seq)
    mem_out = jax.block_until_ready(h_out['mem'])
    spk_ref, mem_ref = _lif_ref_rollout(x_seq, h['mem'], neuron.beta, neuron.factor)
    assert spk_seq.shape == (T, B, N) and mem_out.shape == (B, N)
    assert jnp.array_equal(spk_seq, spk_ref), "fused rollout: spike mismatch"
    assert jnp.allclose(mem_out, mem_ref, atol=1e-5, rtol=1e-5), \
        "fused rollout: membrane mismatch"

    # --- Test 2: per-step API (T=1 path) matches the rollout -----------------
    h2 = neuron.get_initial_state(B)
    for t in range(T):
        spk_t, h2 = neuron(x_seq[t], h2)
        spk_t = jax.block_until_ready(spk_t)
        assert jnp.array_equal(spk_t, spk_ref[t]), f"step spike mismatch t={t}"
    assert jnp.allclose(h2['mem'], mem_ref, atol=1e-5, rtol=1e-5), \
        "per-step: final membrane mismatch"

    # --- Test 3: lane-widened dense view (B=8, N=512 -> (8, 512)) ------------
    B3, N3, T3 = 8, 512, 4
    neuron3 = LIFNeuron(N3, {'TAU': 5.0, '1-beta': 'improved',
                             'SPIKE_FN': 'bellec'})
    h3 = neuron3.get_initial_state(B3)
    x3 = 2.0 * jax.random.normal(k2, (T3, B3, N3), jnp.float32)
    spk3, h3o = neuron3.unroll(x3, h3)
    spk3 = jax.block_until_ready(spk3)
    spk3_ref, mem3_ref = _lif_ref_rollout(x3, h3['mem'], neuron3.beta,
                                          neuron3.factor)
    assert jnp.array_equal(spk3, spk3_ref), "widened view: spike mismatch"
    assert jnp.allclose(h3o['mem'], mem3_ref, atol=1e-5, rtol=1e-5)

    # --- Test 4: non-128-aligned size exercises the pad+slice path -----------
    B4, N4, T4 = 3, 50, 5
    neuron4 = LIFNeuron(N4, {'TAU': 8.0, '1-beta': True,
                             'SPIKE_FN': 'superspike'})
    h4 = neuron4.get_initial_state(B4)
    x4 = 2.0 * jax.random.normal(k3, (T4, B4, N4), jnp.float32)
    spk4, h4o = neuron4.unroll(x4, h4)
    spk4 = jax.block_until_ready(spk4)
    spk4_ref, mem4_ref = _lif_ref_rollout(x4, h4['mem'], neuron4.beta,
                                          neuron4.factor)
    assert jnp.array_equal(spk4, spk4_ref), "padded view: spike mismatch"
    assert jnp.allclose(h4o['mem'], mem4_ref, atol=1e-5, rtol=1e-5)

    print("KERNEL_OK")
</pallas_src>

<mosaic_0001>
module attributes {stable_mosaic.version = 11 : i64} {
  func.func @_lif_seq_kernel(%arg0: i32, %arg1: i32, %arg2: memref<1x8x128xf32, #tpu.memory_space<vmem>>, %arg3: memref<8x128xf32, #tpu.memory_space<vmem>>, %arg4: memref<1x8x128xf32, #tpu.memory_space<vmem>>, %arg5: memref<8x128xf32, #tpu.memory_space<vmem>>) attributes {dimension_semantics = [#tpu.dimension_semantics<parallel>, #tpu.dimension_semantics<arbitrary>], iteration_bounds = array<i64: 1, 8>, scalar_prefetch = 0 : i64, scratch_operands = 0 : i64, tpu.core_type = #tpu.core_type<tc>, window_params = [{transform_indices = @transform_0, window_bounds = array<i64: 1, 8, 128>}, {transform_indices = @transform_1, window_bounds = array<i64: 8, 128>}, {transform_indices = @transform_2, window_bounds = array<i64: 1, 8, 128>}, {transform_indices = @transform_3, window_bounds = array<i64: 8, 128>}]} {
    %c0_i32 = arith.constant 0 : i32
    %0 = arith.cmpi eq, %arg1, %c0_i32 : i32
    %1 = arith.extui %0 : i1 to i32
    %c0_i32_0 = arith.constant 0 : i32
    %2 = arith.cmpi ne, %1, %c0_i32_0 : i32
    scf.if %2 {
      %c0_12 = arith.constant 0 : index
      %c0_13 = arith.constant 0 : index
      %20 = vector.load %arg3[%c0_12, %c0_13] : memref<8x128xf32, #tpu.memory_space<vmem>>, vector<8x128xf32>
      %c0_14 = arith.constant 0 : index
      %c0_15 = arith.constant 0 : index
      %21 = vector.load %arg5[%c0_14, %c0_15] : memref<8x128xf32, #tpu.memory_space<vmem>>, vector<8x128xf32>
      tpu.vector_store %arg5[%c0_14, %c0_15], %20 {strides = array<i32>} : memref<8x128xf32, #tpu.memory_space<vmem>>, vector<8x128xf32>,
    } else {
    }
    %c0 = arith.constant 0 : index
    %c0_1 = arith.constant 0 : index
    %3 = vector.load %arg5[%c0, %c0_1] : memref<8x128xf32, #tpu.memory_space<vmem>>, vector<8x128xf32>
    %cst = arith.constant 0.904837429 : f32
    %4 = vector.broadcast %cst : f32 to vector<8x128xf32>
    %5 = arith.mulf %4, %3 : vector<8x128xf32>
    %c0_2 = arith.constant 0 : index
    %c0_3 = arith.constant 0 : index
    %c0_4 = arith.constant 0 : index
    %6 = vector.load %arg2[%c0_2, %c0_3, %c0_4] : memref<1x8x128xf32, #tpu.memory_space<vmem>>, vector<1x8x128xf32>
    %7 = vector.shape_cast %6 : vector<1x8x128xf32> to vector<8x128xf32>
    %cst_5 = arith.constant 0.0951625854 : f32
    %8 = vector.broadcast %cst_5 : f32 to vector<8x128xf32>
    %9 = arith.mulf %8, %7 : vector<8x128xf32>
    %10 = arith.addf %5, %9 : vector<8x128xf32>
    %cst_6 = arith.constant 1.000000e+00 : f32
    %11 = vector.broadcast %cst_6 : f32 to vector<8x128xf32>
    %12 = arith.cmpf ogt, %10, %11 : vector<8x128xf32>
    %13 = arith.extui %12 : vector<8x128xi1> to vector<8x128xi32>
    %14 = arith.sitofp %13 : vector<8x128xi32> to vector<8x128xf32>
    %c0_7 = arith.constant 0 : index
    %c0_8 = arith.constant 0 : index
    %c0_9 = arith.constant 0 : index
    %15 = vector.load %arg4[%c0_7, %c0_8, %c0_9] : memref<1x8x128xf32, #tpu.memory_space<vmem>>, vector<1x8x128xf32>
    %16 = vector.shape_cast %15 : vector<1x8x128xf32> to vector<8x128xf32>
    %17 = vector.shape_cast %14 : vector<8x128xf32> to vector<1x8x128xf32>
    tpu.vector_store %arg4[%c0_7, %c0_8, %c0_9], %17 {strides = array<i32>} : memref<1x8x128xf32, #tpu.memory_space<vmem>>, vector<1x8x128xf32>,
    %18 = arith.subf %10, %14 : vector<8x128xf32>
    %c0_10 = arith.constant 0 : index
    %c0_11 = arith.constant 0 : index
    %19 = vector.load %arg5[%c0_10, %c0_11] : memref<8x128xf32, #tpu.memory_space<vmem>>, vector<8x128xf32>
    tpu.vector_store %arg5[%c0_10, %c0_11], %18 {strides = array<i32>} : memref<8x128xf32, #tpu.memory_space<vmem>>, vector<8x128xf32>,
    return
  }
  func.func @transform_0(%arg0: i32, %arg1: i32) -> (i32, i32, i32) {
    %c0_i32 = arith.constant 0 : i32
    %c0_i32_0 = arith.constant 0 : i32
    return %arg1, %arg0, %c0_i32 : i32, i32, i32
  }
  func.func @transform_1(%arg0: i32, %arg1: i32) -> (i32, i32) {
    %c0_i32 = arith.constant 0 : i32
    %c0_i32_0 = arith.constant 0 : i32
    return %arg0, %c0_i32 : i32, i32
  }
  func.func @transform_2(%arg0: i32, %arg1: i32) -> (i32, i32, i32) {
    %c0_i32 = arith.constant 0 : i32
    %c0_i32_0 = arith.constant 0 : i32
    return %arg1, %arg0, %c0_i32 : i32, i32, i32
  }
  func.func @transform_3(%arg0: i32, %arg1: i32) -> (i32, i32) {
    %c0_i32 = arith.constant 0 : i32
    %c0_i32_0 = arith.constant 0 : i32
    return %arg0, %c0_i32 : i32, i32
  }
}

</mosaic_0001>

<bundles_post_ra>
// kernel: tpu_custom_call.1
= control target key start
LH: loop header
LB: loop body
LE: loop exit
PB: predicated region body
PF: predicated region fallthrough
CT: control target
= control target key end

     0   :  { %9 = vsyncpa [#allocation3], 0  ;;  %s922_s0 = inlined_call_operand.hbm [shape: f32[8,8,128], index: 0, kind: input, shape index: {}]   ;;  %s923_s1 = inlined_call_operand.hbm [shape: f32[8,128], index: 1, kind: input, shape index: {}]   ;;  %s924_s2 = inlined_call_operand.hbm [shape: f32[8,8,128], index: 2, kind: output, shape index: {0}]   ;;  %s925_s3 = inlined_call_operand.hbm [shape: f32[8,128], index: 3, kind: output, shape index: {1}]  }
   0x1   :  { %11 = vsyncpa [#allocation3 + $0x1], 0 }
   0x2   :  { %12 = vsyncpa [#allocation6], 0 }
   0x3   :  { %13 = vsyncpa [#allocation4], 0 }
   0x4   :  { %15 = vsyncpa [#allocation4 + $0x1], 0 }
   0x5   :  { %16 = vsyncpa [#allocation9], 0  ;;  %s678_s12 = smov 0   ;;  %s680_s13 = smov 0  }
   0x6   :  { %s682_s14 = smov 0   ;;  %s684_s15 = smov 0  }
   0x7   :  { %s686_s16 = smov 0   ;;  %s688_s17 = smov 0  }
   0x8 LB: > { %s377_s18 = sadd.s32 4294967295, %s651_s17   ;;  %s378_s19 = sadd.s32 4294967294, %s651_s17   ;;  %s651_s17 = sphi %s688_s17, %s22_s17   ;;  %s647_s16 = sphi %s686_s16, %s951_s16   ;;  %s643_s15 = sphi %s684_s15, %s950_s15   ;;  %s639_s14 = sphi %s682_s14, %s949_s14   ;;  %s635_s13 = sphi %s680_s13, %s948_s13   ;;  %s631_s12 = sphi %s678_s12, %s947_s12  }
   0x9   : > { %p56_p0 = scmp.ne.s32.totalorder %s635_s13, %s631_s12  ;;  %p712_p1 = scmp.eq.s32.totalorder %s377_s18, 0 }
   0xa   : > { %p716_p2 = scmp.eq.s32.totalorder %s377_s18, 7  ;;  %p114_p3 = scmp.eq.s32.totalorder %s378_s19, 7 }
   0xb   : > { %s931_s20 = scalar_select %p712_p1, 1, 0 }
   0xc   : > { %s932_s21 = scalar_select %p716_p2, 1, 0 }
   0xd   : > { %p722_p4 = por %p712_p1, %p56_p0  ;;  %p379_p5 = scmp.ge.s32.totalorder %s651_s17, 1 }
   0xe   : > { %p727_p6 = por %p114_p3, %p56_p0  ;;  %p147_p7 = scmp.lt.s32.totalorder %s651_s17, 9 }
   0xf   : > { %s933_s22 = scalar_select %p722_p4, 1, 0 }
  0x10   : > { %s934_s23 = scalar_select %p727_p6, 1, 0 }
  0x11   : > { %p732_p8 = pnand %p379_p5, %p147_p7  ;;  %s653_s25 = smov [#allocation5]  }
  0x12   : > { %s162_s26 = sshll.u32 %s653_s25, 4  ;;  %s31_s28 = sadd.s32 1, %s647_s16  ;;  %s163_s26 = int_to_ptr.vmem [resolvable:$true] %s162_s26 }
  0x13   : > { %s935_s24 = scalar_select %p732_p8, 1, 0 }
  0x14   : > { %p408_p9 = pneg %p732_p8  ;;  %s43_s29 = sadd.s32 1, %s639_s14 }
  0x15   : > { %p746_p11 = scmp.ge.s32.totalorder %s31_s28, 8  ;;  %s477_s6 = scalar_lea.hbm %s923_s1, 128 }
  0x16   : > { %p740_p10 = pnand %p408_p9, %p712_p1  ;;  %p478_p12 = scmp.ne.s32.totalorder %s923_s1, %s477_s6 }
  0x17   : > { %s937_s30 = scalar_select %p746_p11, 1, 0 }
  0x18   : > { %p479_p13 = pneg %p740_p10  ;;  %p484_p5 = scmp.lt.u32.totalorder %s477_s6, %s923_s1 }
  0x1a   : > { %p480_p0 = pnand %p479_p13, %p478_p12 }
  0x1c   : > { %p481_p3 = pneg %p480_p0 }
  0x1e   : > { %p486_p7 = pnand %p484_p5, %p481_p3 }
  0x20   : > { %489 = shalt.err (!%p486_p7)
}
  0x21   : > { %s490_s11 = scalar_lea.vmem %s163_s26, 128  ;;  %p498_p4 = scmp.lt.s32.totalorder %s163_s26, %s163_s26 }
  0x22   : > { %p491_p9 = scmp.ne.s32.totalorder %s163_s26, %s490_s11  ;;  %p499_p8 = scmp.lt.s32.totalorder %s490_s11, %s490_s11 }
  0x24   : > { %p493_p6 = pnand %p491_p9, %p479_p13  ;;  %p500_p2 = por %p499_p8, %p498_p4 }
  0x26   : > { %p494_p1 = pneg %p493_p6 }
  0x28   : > { %p501_p11 = pnand %p500_p2, %p494_p1 }
  0x2a   : > { %504 = shalt.err (!%p501_p11)
}
  0x2b   : > { %411 = dma.hbm_to_vmem [thread:$0]  (!%p740_p10), %s923_s1, 128, %s163_s26, [#allocation6]  }
  0x2c   : > { %p938_p4 = scmp.ne.s32.totalorder %s937_s30, 0  ;;  %p50_p1 = scmp.ne.s32.totalorder %s639_s14, %s635_s13 }
  0x2d   : > { %p51_p2 = scmp.eq.s32.totalorder %s651_s17, 0  ;;  %p421_p6 = scmp.lt.s32.totalorder %s651_s17, 8 }
  0x2e   : > { %s953_s28 = smov (%p938_p4, %s31_s28), 0  ;;  %p939_p12 = scmp.ne.s32.totalorder %s932_s21, 0 }
  0x2f   : > { %s38_s25 = ssub.s32 %s647_s16, %s953_s28  ;;  %p52_p11 = por %p51_p2, %p50_p1 }
  0x30   : > { %p41_p8 = scmp.eq.s32.totalorder %s38_s25, 0  ;;  %p778_p13 = por %p939_p12, %p50_p1 }
  0x31   : > { %s173_s4 = sand.u32 1, %s639_s14   ;;  %s383_s30 = sshll.u32 %s647_s16, 7 }
  0x32   : > { %s786_s5 = scalar_select %p41_p8, %s639_s14, %s43_s29  }
  0x33   : > { %s382_s26 = sshll.u32 %s173_s4, 3  ;;  %s792_s8 = scalar_lea.hbm %s922_s0, %s383_s30 }
  0x34   : > { %s177_s9 = scalar_lea.vmem [#allocation2], %s382_s26  ;;  %p796_p10 = pnand %p421_p6, %p52_p11 }
  0x35   : > { %s185_s10 = sshll.u32 %s177_s9, 4  ;;  %s174_s29 = scalar_lea.sflag [#allocation3], %s173_s4  ;;  %s794_s10 = int_to_ptr.vmem [resolvable:$true] %s185_s10 }
  0x36   : > { %s505_s18 = scalar_lea.hbm %s792_s8, 128  ;;  %p507_p3 = pneg %p796_p10 }
  0x37   : > { %p506_p0 = scmp.ne.s32.totalorder %s792_s8, %s505_s18  ;;  %s510_s26 = scalar_lea.hbm %s922_s0, 1024 }
  0x38   : > { %p511_p9 = scmp.lt.u32.totalorder %s792_s8, %s922_s0  ;;  %p512_p4 = scmp.lt.u32.totalorder %s510_s26, %s505_s18 }
  0x39   : > { %p508_p5 = pnand %p507_p3, %p506_p0  ;;  %p514_p2 = scmp.lt.u32.totalorder %s505_s18, %s792_s8 }
  0x3a   : > { %p513_p1 = por %p512_p4, %p511_p9 }
  0x3b   : > { %p509_p7 = pneg %p508_p5 }
  0x3c   : > { %p515_p6 = por %p514_p2, %p513_p1 }
  0x3e   : > { %p516_p8 = pnand %p515_p6, %p509_p7 }
  0x40   : > { %519 = shalt.err (!%p516_p8)
}
  0x41   : > { %s520_s4 = scalar_lea.vmem %s794_s10, 128  ;;  %s654_s7 = smov [#allocation2]  }
  0x42   : > { %p521_p11 = scmp.ne.s32.totalorder %s794_s10, %s520_s4  ;;  %s525_s9 = sshll.u32 %s654_s7, 4  ;;  %s526_s9 = int_to_ptr.vmem [resolvable:$false] %s525_s9 }
  0x43   : > { %s527_s19 = scalar_lea.vmem %s526_s9, 256  ;;  %p528_p5 = scmp.lt.s32.totalorder %s794_s10, %s526_s9 }
  0x44   : > { %p523_p12 = pnand %p521_p11, %p507_p3  ;;  %p529_p9 = scmp.lt.s32.totalorder %s527_s19, %s520_s4 }
  0x46   : > { %p524_p0 = pneg %p523_p12  ;;  %p530_p4 = por %p529_p9, %p528_p5 }
  0x48   : > { %p531_p1 = pnand %p530_p4, %p524_p0 }
  0x4a   : > { %534 = shalt.err (!%p531_p1)
}
  0x4b   : > { %415 = dma.hbm_to_vmem [thread:$0]  (!%p796_p10), %s792_s8, 128, %s794_s10, %s174_s29  }
  0x4c   : > { %p942_p7 = scmp.ne.s32.totalorder %s935_s24, 0 }
  0x4d   : > { %s828_s18 = sand.u32 (!%p942_p7), 1, %s635_s13   ;;  %p943_p3 = scmp.ne.s32.totalorder (!%p942_p7), %s933_s22, 0 }
  0x4e   : > { %194 = sbr.rel (%p942_p7) target bundleno = 146 (0x92), region = 28  ;;  %s385_s25 = sshll.u32 (!%p942_p7), %s828_s18, 3 }
  0x4f   : > { %s197_s26 = scalar_lea.sflag (!%p942_p7), [#allocation3], %s828_s18  ;;  %s200_s30 = scalar_lea.vmem (!%p942_p7), [#allocation2], %s385_s25 }
  0x55   : > { %614 = dma.done.wait (%p943_p3), %s197_s26, 128  }
  0x56   : > { %616 = vsyncadd (%p943_p3), %s197_s26, 4294967168  ;;  %p944_p2 = scmp.ne.s32.totalorder %s931_s20, 0 }
  0x58   : > { %618 = dma.done.wait (%p944_p2), [#allocation6], 128  }
  0x59   : > { %620 = vsyncadd (%p944_p2), [#allocation6], 4294967168  ;;  %s224_s24 = scalar_lea.vmem [#allocation7], %s385_s25  ;;  %p388_p10 = scmp.ne.s32.totalorder %s643_s15, 0 }
  0x5a   : > { %v231_v0 = vld [vmem:[#allocation5] sm:$0xff] (!%p388_p10) }
  0x5b   : > { %230 = sbr.rel (%p388_p10) target bundleno = 98 (0x62), region = 40  ;;  %232 = vst [vmem:[#allocation8] sm:$0xff] (!%p388_p10), %v231_v0 }
  0x62 PF: > { %v233_v1 = vld [vmem:[#allocation8] sm:$0xff]  ;;  %s391_s22 = sshll.u32 %s643_s15, 7  ;;  %s259_s8 = sshll.u32 %s224_s24, 4  ;;  %v656_v6 = vmov 0.0   ;;  %s847_s8 = int_to_ptr.vmem [resolvable:$true] %s259_s8 }
  0x63   : > { %v235_v2 = vld [vmem:[%s200_s30] sm:$0xff]  ;;  %v234_v3 = vmul.f32 0.9048374, %v233_v1  ;;  %s655_s10 = smov [#allocation8]   ;;  %s845_s6 = scalar_lea.hbm %s924_s2, %s391_s22 }
  0x64   : > { %v236_v4 = vmul.f32 0.095162585, %v235_v2  ;;  %s272_s20 = sshll.u32 %s655_s10, 4  ;;  %s245_s15 = scalar_lea.sflag [#allocation4], %s828_s18  ;;  %s849_s20 = int_to_ptr.vmem [resolvable:$true] %s272_s20 }
  0x65   : > { %s535_s4 = scalar_lea.vmem %s847_s8, 128  ;;  %s657_s7 = smov [#allocation7]  }
  0x66   : > { %v237_v5 = vadd.f32 %v236_v4, %v234_v3  ;;  %p536_p6 = scmp.ne.s32.totalorder %s847_s8, %s535_s4  ;;  %s539_s9 = sshll.u32 %s657_s7, 4  ;;  %s540_s9 = int_to_ptr.vmem [resolvable:$false] %s539_s9 }
  0x67   : > { %s541_s19 = scalar_lea.vmem %s540_s9, 256  ;;  %p542_p12 = scmp.lt.s32.totalorder %s847_s8, %s540_s9 }
  0x68   : > { %vm238_vm0 = vcmp.gt.f32.partialorder %v237_v5, 1.0  ;;  %p537_p8 = pnand %p536_p6, %p778_p13  ;;  %p543_p0 = scmp.lt.s32.totalorder %s541_s19, %s535_s4 }
  0x69   : > { %v389_v7 = vsel %vm238_vm0, 1.0, %v656_v6 }
  0x6a   : > { %241 = vst [vmem:[%s224_s24] sm:$0xff] %v389_v7  ;;  %v242_v8 = vsub.f32 %v237_v5, %v389_v7  ;;  %p538_p11 = pneg %p537_p8  ;;  %p544_p5 = por %p543_p0, %p542_p12 }
  0x6c   : > { %p545_p9 = pnand %p544_p5, %p538_p11 }
  0x6e   : > { %548 = shalt.err (!%p545_p9)
}
  0x6f   : > { %s549_s18 = scalar_lea.hbm %s845_s6, 128  ;;  %s553_s30 = scalar_lea.hbm %s924_s2, 1024 }
  0x70   : > { %p550_p4 = scmp.ne.s32.totalorder %s845_s6, %s549_s18  ;;  %p554_p3 = scmp.lt.u32.totalorder %s845_s6, %s924_s2 }
  0x71   : > { %p555_p2 = scmp.lt.u32.totalorder %s553_s30, %s549_s18  ;;  %p557_p6 = scmp.lt.u32.totalorder %s549_s18, %s845_s6 }
  0x72   : > { %p551_p1 = pnand %p550_p4, %p778_p13 }
  0x73   : > { %p556_p10 = por %p555_p2, %p554_p3 }
  0x74   : > { %p552_p7 = pneg %p551_p1 }
  0x75   : > { %p558_p8 = por %p557_p6, %p556_p10 }
  0x77   : > { %p559_p11 = pnand %p558_p8, %p552_p7 }
  0x79   : > { %562 = shalt.err (!%p559_p11)
}
  0x7a   : > { %402 = dma.vmem_to_hbm [thread:$0]  (%p778_p13), %s847_s8, 128, %s845_s6, %s245_s15   ;;  %243 = vst [vmem:[#allocation8] sm:$0xff] %v242_v8 }
  0x7b   : > { %s563_s10 = scalar_lea.vmem %s849_s20, 128  ;;  %p945_p0 = scmp.ne.s32.totalorder %s932_s21, 0 }
  0x7c   : > { %p564_p12 = scmp.ne.s32.totalorder %s849_s20, %s563_s10  ;;  %p570_p4 = scmp.lt.s32.totalorder %s849_s20, %s849_s20 }
  0x7d   : > { %p571_p1 = scmp.lt.s32.totalorder %s563_s10, %s563_s10 }
  0x7e   : > { %p565_p5 = pnand %p564_p12, %p945_p0 }
  0x7f   : > { %p572_p7 = por %p571_p1, %p570_p4 }
  0x80   : > { %p566_p9 = pneg %p565_p5 }
  0x82   : > { %p573_p3 = pnand %p572_p7, %p566_p9 }
  0x84   : > { %576 = shalt.err (!%p573_p3)
}
  0x85   : > { %s577_s29 = scalar_lea.hbm %s925_s3, 128 }
  0x86   : > { %p578_p13 = scmp.ne.s32.totalorder %s925_s3, %s577_s29  ;;  %p583_p6 = scmp.lt.u32.totalorder %s577_s29, %s925_s3 }
  0x88   : > { %p579_p2 = pnand %p578_p13, %p945_p0 }
  0x8a   : > { %p580_p10 = pneg %p579_p2 }
  0x8c   : > { %p585_p8 = pnand %p583_p6, %p580_p10 }
  0x8e   : > { %588 = shalt.err (!%p585_p8)
}
  0x8f   : > { %404 = dma.vmem_to_hbm [thread:$0]  (%p945_p0), %s849_s20, 128, %s925_s3, [#allocation9]  }
  0x90   : > { %622 = dma.done.wait (%p945_p0), [#allocation9], 128  }
  0x91   : > { %624 = vsyncadd (%p945_p0), [#allocation9], 4294967168 }
  0x92 PF: > { %p425_p11 = scmp.ge.s32.totalorder %s651_s17, 2  ;;  %s288_s19 = sand.u32 1, %s631_s12  }
  0x93   : > { %p946_p12 = scmp.ne.s32.totalorder %s934_s23, 0  ;;  %s289_s18 = scalar_lea.sflag [#allocation4], %s288_s19 }
  0x95   : > { %p417_p5 = pnand %p425_p11, %p946_p12 }
  0x97   : > { %626 = dma.done.wait (!%p417_p5), %s289_s18, 128  }
  0x98   : > { %628 = vsyncadd (!%p417_p5), %s289_s18, 4294967168  ;;  %s22_s17 = sadd.s32 1, %s651_s17   ;;  %s947_s12 = smov %s635_s13 }
  0x99   : > { %p19_p9 = scmp.ge.s32.totalorder %s22_s17, 10   ;;  %s948_s13 = smov %s639_s14 }
  0x9a   : > { %s949_s14 = smov %s786_s5  ;;  %s950_s15 = smov %s647_s16 }
  0x9b   : > { %s951_s16 = smov %s953_s28  ;;  %21 = sbr.rel (!%p19_p9) target bundleno = 8 (0x8), region = 91 }
  0xa2   :  { %294 = vsyncpa [#allocation3], 1 }
  0xa3   :  { %296 = vsyncpa [#allocation3 + $0x1], 1 }
  0xa4   :  { %297 = vsyncpa [#allocation6], 1 }
  0xa5   :  { %298 = vsyncpa [#allocation4], 1 }
  0xa6   :  { %300 = vsyncpa [#allocation4 + $0x1], 1 }
  0xa7   :  { %301 = vsyncpa [#allocation9], 1 }

</bundles_post_ra>
